<compile_context>
chip_gen: v6e
topology: v6e:2x2x1
jax: 0.10.0
libtpu: 0.0.40
codegen_flags: <defaults>
</compile_context>

<pallas_src>
import functools

import jax
import jax.numpy as jnp
from jax.experimental import pallas as pl
from jax.experimental.pallas import tpu as pltpu


def _round_up(v, m):
    return ((v + m - 1) // m) * m


def _chip_caps():
    """Chip-dependent byte budgets (fallback = conservative v7x-like config)."""
    vmem = 64 * 1024 * 1024
    try:
        vmem = int(pltpu.get_tpu_info().vmem_capacity_bytes)
    except Exception:
        pass
    if vmem <= 80 * 1024 * 1024:
        # v7x-like: 64 MiB VMEM, very fast HBM -> bigger streamed tiles.
        return dict(stream_bytes=6 << 20, fused_bytes=3 << 20, vmem_limit=40 << 20)
    # v5e / v6e: 128 MiB VMEM.
    return dict(stream_bytes=4 << 20, fused_bytes=6 << 20, vmem_limit=64 << 20)


def _pick_tile(hw, c, itemsize, target_bytes):
    """Lane tile: multiple of 128, sized by bytes (~target_bytes per buffer)."""
    hw_r = _round_up(hw, 128)
    max_lanes = max(128, (target_bytes // max(1, c * itemsize)) // 128 * 128)
    return min(hw_r, max_lanes)


def _mlp_gate(w1, w2, avg, mx):
    """sigmoid(fc(avg) + fc(mx)) with fc = w2 @ relu(w1 @ v); avg/mx: (C, 1) f32."""
    ha = jnp.maximum(jnp.dot(w1, avg, preferred_element_type=jnp.float32), 0.0)
    hm = jnp.maximum(jnp.dot(w1, mx, preferred_element_type=jnp.float32), 0.0)
    y = (jnp.dot(w2, ha, preferred_element_type=jnp.float32)
         + jnp.dot(w2, hm, preferred_element_type=jnp.float32))
    return jax.nn.sigmoid(y)                                   # (C, 1) f32


# ---------------------------------------------------------------------------
# Fused single-pass kernel: whole image resident, 2x HBM traffic total.
# ---------------------------------------------------------------------------
def _fused_kernel(x_ref, w1_ref, w2_ref, o_ref, *, hw):
    x = x_ref[0]                                               # (C, HW), native dtype
    xf = x.astype(jnp.float32)
    s = jnp.sum(xf, axis=1, keepdims=True)                     # (C, 1)
    m = jnp.max(xf, axis=1, keepdims=True)                     # (C, 1)
    attn = _mlp_gate(w1_ref[...], w2_ref[...], s * (1.0 / hw), m)
    o_ref[0] = (x * attn.astype(x.dtype)).astype(o_ref.dtype)


# ---------------------------------------------------------------------------
# Phase 1 (streaming): per-channel sum/max over HW tiles + shared MLP gate.
# ---------------------------------------------------------------------------
def _stats_kernel(x_ref, w1_ref, w2_ref, attn_ref, sum_sc, max_sc, *, hw, tile):
    t = pl.program_id(1)
    nt = pl.num_programs(1)

    @pl.when(t == 0)
    def _():
        sum_sc[...] = jnp.zeros_like(sum_sc)
        max_sc[...] = jnp.full_like(max_sc, -jnp.inf)

    def accumulate(masked):
        x = x_ref[0].astype(jnp.float32)                       # (C, T) f32 accumulate
        xs, xm = x, x
        if masked:                                             # static: ragged tail only
            lane = jax.lax.broadcasted_iota(jnp.int32, x.shape, 1) + t * tile
            valid = lane < hw
            xs = jnp.where(valid, x, 0.0)
            xm = jnp.where(valid, x, -jnp.inf)
        sum_sc[...] = sum_sc[...] + jnp.sum(xs, axis=1, keepdims=True)
        max_sc[...] = jnp.maximum(max_sc[...], jnp.max(xm, axis=1, keepdims=True))

    if hw % tile != 0:
        # Only the last (ragged) tile pays the iota/compare/select cost.
        @pl.when(t < nt - 1)
        def _():
            accumulate(False)

        @pl.when(t == nt - 1)
        def _():
            accumulate(True)
    else:
        accumulate(False)

    @pl.when(t == nt - 1)
    def _():
        avg = sum_sc[...] * (1.0 / hw)                         # true HW, not padded
        attn_ref[0] = _mlp_gate(w1_ref[...], w2_ref[...], avg,
                                max_sc[...]).astype(attn_ref.dtype)


# ---------------------------------------------------------------------------
# Phase 2 (streaming): lane-dense elementwise apply in native dtype.
# ---------------------------------------------------------------------------
def _apply_kernel(x_ref, attn_ref, o_ref):
    o_ref[0] = x_ref[0] * attn_ref[0]                          # attn: (C, 1) broadcast


def channel_attention(x, w1, w2, *, fused_cap_bytes=None, stream_target_bytes=None):
    """x: (B, C, H, W); w1: (C//r, C); w2: (C, C//r).  Returns (B, C, H, W)."""
    B, C, H, W = x.shape
    Cr = w1.shape[0]
    HW = H * W
    itemsize = x.dtype.itemsize

    caps = _chip_caps()
    if fused_cap_bytes is None:
        fused_cap_bytes = caps["fused_bytes"]
    if stream_target_bytes is None:
        stream_target_bytes = caps["stream_bytes"]
    vmem_limit = caps["vmem_limit"]

    xr = x.reshape(B, C, HW)
    w1 = w1.astype(jnp.float32)
    w2 = w2.astype(jnp.float32)

    slab_bytes = C * HW * itemsize

    # ---------------- Fused single-pass path ----------------
    if slab_bytes <= fused_cap_bytes:
        out = pl.pallas_call(
            functools.partial(_fused_kernel, hw=HW),
            out_shape=jax.ShapeDtypeStruct((B, C, HW), x.dtype),
            grid=(B,),
            in_specs=[
                pl.BlockSpec((1, C, HW), lambda b: (b, 0, 0)),
                pl.BlockSpec((Cr, C), lambda b: (0, 0)),       # weights stay resident
                pl.BlockSpec((C, Cr), lambda b: (0, 0)),
            ],
            out_specs=pl.BlockSpec((1, C, HW), lambda b: (b, 0, 0)),
            compiler_params=pltpu.CompilerParams(
                dimension_semantics=("parallel",),
                vmem_limit_bytes=vmem_limit,
            ),
            cost_estimate=pl.CostEstimate(
                flops=3 * B * C * HW + 8 * B * C * Cr,
                transcendentals=B * C,
                bytes_accessed=2 * B * C * HW * itemsize + 2 * C * Cr * 4,
            ),
        )(xr, w1, w2)
        return out.reshape(B, C, H, W)

    # ---------------- Streaming two-phase path ----------------
    tile = _pick_tile(HW, C, itemsize, stream_target_bytes)
    n_t = pl.cdiv(HW, tile)

    # Phase 1: stats + gate MLP -> attn (B, C, 1) float32.  No wrapper pad:
    # the ragged boundary block is masked in-kernel on the last tile only.
    attn = pl.pallas_call(
        functools.partial(_stats_kernel, hw=HW, tile=tile),
        out_shape=jax.ShapeDtypeStruct((B, C, 1), jnp.float32),
        grid=(B, n_t),
        in_specs=[
            pl.BlockSpec((1, C, tile), lambda b, t: (b, 0, t)),
            pl.BlockSpec((Cr, C), lambda b, t: (0, 0)),
            pl.BlockSpec((C, Cr), lambda b, t: (0, 0)),
        ],
        out_specs=pl.BlockSpec((1, C, 1), lambda b, t: (b, 0, 0)),
        scratch_shapes=[
            pltpu.VMEM((C, 1), jnp.float32),                   # running sum
            pltpu.VMEM((C, 1), jnp.float32),                   # running max
        ],
        compiler_params=pltpu.CompilerParams(
            dimension_semantics=("parallel", "arbitrary"),
            vmem_limit_bytes=vmem_limit,
        ),
        cost_estimate=pl.CostEstimate(
            flops=2 * B * C * HW + 8 * B * C * Cr,
            transcendentals=B * C,
            bytes_accessed=B * C * HW * itemsize + B * C * 4 + 2 * C * Cr * 4,
        ),
    )(xr, w1, w2)

    # Cast the gate once; phase 2 multiplies in the input's native dtype.
    attn = attn.astype(x.dtype)

    # Phase 2: out = x * attn, streamed at the HBM roofline.  OOB writes of the
    # ragged boundary block are masked by Pallas; no output slice needed.
    out = pl.pallas_call(
        _apply_kernel,
        out_shape=jax.ShapeDtypeStruct((B, C, HW), x.dtype),
        grid=(B, n_t),
        in_specs=[
            pl.BlockSpec((1, C, tile), lambda b, t: (b, 0, t)),
            pl.BlockSpec((1, C, 1), lambda b, t: (b, 0, 0)),
        ],
        out_specs=pl.BlockSpec((1, C, tile), lambda b, t: (b, 0, t)),
        compiler_params=pltpu.CompilerParams(
            dimension_semantics=("parallel", "parallel"),
            vmem_limit_bytes=vmem_limit,
        ),
        cost_estimate=pl.CostEstimate(
            flops=B * C * HW,
            transcendentals=0,
            bytes_accessed=2 * B * C * HW * itemsize + B * C * itemsize,
        ),
    )(xr, attn)

    return out.reshape(B, C, H, W)


def channel_attention_ref(x, w1, w2):
    """Pure-JAX reference mirroring the PyTorch forward."""
    avg = jnp.mean(x, axis=(2, 3))                             # (B, C)
    mx = jnp.max(x, axis=(2, 3))                               # (B, C)

    def fc(v):                                                 # v: (B, C)
        h = jnp.maximum(v @ w1.T, 0.0)                         # (B, C//r)
        return h @ w2.T                                        # (B, C)

    attn = jax.nn.sigmoid(fc(avg) + fc(mx))                    # (B, C)
    return attn[:, :, None, None] * x


if __name__ == "__main__":
    B, C, H, W = 2, 8, 16, 16
    ratio = 4
    Cr = C // ratio

    key = jax.random.PRNGKey(0)
    kx, k1, k2 = jax.random.split(key, 3)
    x = jax.random.normal(kx, (B, C, H, W), dtype=jnp.float32)
    # Conv2d(C, C//r, 1, bias=False).weight -> (C//r, C, 1, 1) squeezed.
    w1 = jax.random.normal(k1, (Cr, C), dtype=jnp.float32) * 0.1
    # Conv2d(C//r, C, 1, bias=False).weight -> (C, C//r, 1, 1) squeezed.
    w2 = jax.random.normal(k2, (C, Cr), dtype=jnp.float32) * 0.1

    # Fused single-pass path (image slab fits in VMEM) -- the default dispatch.
    out = jax.block_until_ready(channel_attention(x, w1, w2))
    ref = channel_attention_ref(x, w1, w2)
    assert out.shape == (B, C, H, W)
    assert jnp.allclose(out, ref, atol=1e-5, rtol=1e-5), "fused path mismatch"

    # Streaming two-phase path, including a ragged last tile (HW % tile != 0).
    H2 = W2 = 50                                               # HW = 2500, tile = 256
    x2 = jax.random.normal(kx, (B, C, H2, W2), dtype=jnp.float32)
    out2 = jax.block_until_ready(
        channel_attention(x2, w1, w2, fused_cap_bytes=0, stream_target_bytes=8 * 1024))
    ref2 = channel_attention_ref(x2, w1, w2)
    assert out2.shape == (B, C, H2, W2)
    assert jnp.allclose(out2, ref2, atol=1e-5, rtol=1e-5), "streaming path mismatch"

    print("KERNEL_OK")
</pallas_src>

<mosaic_0001>
module attributes {stable_mosaic.version = 11 : i64} {
  func.func @_fused_kernel(%arg0: i32, %arg1: memref<1x8x256xf32, #tpu.memory_space<vmem>>, %arg2: memref<2x8xf32, #tpu.memory_space<vmem>>, %arg3: memref<8x2xf32, #tpu.memory_space<vmem>>, %arg4: memref<1x8x256xf32, #tpu.memory_space<vmem>>) attributes {dimension_semantics = [#tpu.dimension_semantics<parallel>], iteration_bounds = array<i64: 2>, scalar_prefetch = 0 : i64, scratch_operands = 0 : i64, tpu.core_type = #tpu.core_type<tc>, window_params = [{transform_indices = @transform_0, window_bounds = array<i64: 1, 8, 256>}, {pipeline_mode = #tpu.pipeline_mode<synchronous>, transform_indices = @transform_1, window_bounds = array<i64: 2, 8>}, {pipeline_mode = #tpu.pipeline_mode<synchronous>, transform_indices = @transform_2, window_bounds = array<i64: 8, 2>}, {transform_indices = @transform_3, window_bounds = array<i64: 1, 8, 256>}]} {
    %c0 = arith.constant 0 : index
    %c0_0 = arith.constant 0 : index
    %c0_1 = arith.constant 0 : index
    %0 = vector.load %arg1[%c0, %c0_0, %c0_1] : memref<1x8x256xf32, #tpu.memory_space<vmem>>, vector<1x8x256xf32>
    %1 = vector.shape_cast %0 : vector<1x8x256xf32> to vector<8x256xf32>
    %cst = arith.constant dense<0.000000e+00> : vector<8xf32>
    %2 = vector.multi_reduction <add>, %1, %cst [1] : vector<8x256xf32> to vector<8xf32>
    %3 = vector.shape_cast %2 : vector<8xf32> to vector<8x1xf32>
    %cst_2 = arith.constant dense<0xFF800000> : vector<8xf32>
    %4 = vector.multi_reduction <maximumf>, %1, %cst_2 [1] : vector<8x256xf32> to vector<8xf32>
    %5 = vector.shape_cast %4 : vector<8xf32> to vector<8x1xf32>
    %c0_3 = arith.constant 0 : index
    %c0_4 = arith.constant 0 : index
    %6 = vector.load %arg2[%c0_3, %c0_4] : memref<2x8xf32, #tpu.memory_space<vmem>>, vector<2x8xf32>
    %c0_5 = arith.constant 0 : index
    %c0_6 = arith.constant 0 : index
    %7 = vector.load %arg3[%c0_5, %c0_6] : memref<8x2xf32, #tpu.memory_space<vmem>>, vector<8x2xf32>
    %cst_7 = arith.constant 3.906250e-03 : f32
    %8 = vector.broadcast %cst_7 : f32 to vector<8x1xf32>
    %9 = arith.mulf %3, %8 : vector<8x1xf32>
    %cst_8 = arith.constant dense<0.000000e+00> : vector<2x1xf32>
    %10 = tpu.matmul %6, %9, %cst_8 {dimension_numbers = #tpu.dot_dimension_numbers<[1], [0], [0], [1], [0, 0, 1, 1], [], []>} : vector<2x8xf32>, vector<8x1xf32>, vector<2x1xf32> -> vector<2x1xf32>
    %cst_9 = arith.constant 0.000000e+00 : f32
    %11 = vector.broadcast %cst_9 : f32 to vector<2x1xf32>
    %12 = arith.maximumf %10, %11 : vector<2x1xf32>
    %cst_10 = arith.constant dense<0.000000e+00> : vector<2x1xf32>
    %13 = tpu.matmul %6, %5, %cst_10 {dimension_numbers = #tpu.dot_dimension_numbers<[1], [0], [0], [1], [0, 0, 1, 1], [], []>} : vector<2x8xf32>, vector<8x1xf32>, vector<2x1xf32> -> vector<2x1xf32>
    %cst_11 = arith.constant 0.000000e+00 : f32
    %14 = vector.broadcast %cst_11 : f32 to vector<2x1xf32>
    %15 = arith.maximumf %13, %14 : vector<2x1xf32>
    %cst_12 = arith.constant dense<0.000000e+00> : vector<8x1xf32>
    %16 = tpu.matmul %7, %12, %cst_12 {dimension_numbers = #tpu.dot_dimension_numbers<[1], [0], [0], [1], [0, 0, 1, 1], [], []>} : vector<8x2xf32>, vector<2x1xf32>, vector<8x1xf32> -> vector<8x1xf32>
    %cst_13 = arith.constant dense<0.000000e+00> : vector<8x1xf32>
    %17 = tpu.matmul %7, %15, %cst_13 {dimension_numbers = #tpu.dot_dimension_numbers<[1], [0], [0], [1], [0, 0, 1, 1], [], []>} : vector<8x2xf32>, vector<2x1xf32>, vector<8x1xf32> -> vector<8x1xf32>
    %18 = arith.addf %16, %17 : vector<8x1xf32>
    %19 = arith.negf %18 : vector<8x1xf32>
    %20 = math.exp %19 : vector<8x1xf32>
    %cst_14 = arith.constant 1.000000e+00 : f32
    %21 = vector.broadcast %cst_14 : f32 to vector<8x1xf32>
    %22 = arith.addf %21, %20 : vector<8x1xf32>
    %23 = arith.divf %21, %22 : vector<8x1xf32>
    %24 = vector.broadcast %23 : vector<8x1xf32> to vector<8x256xf32>
    %25 = arith.mulf %1, %24 : vector<8x256xf32>
    %c0_15 = arith.constant 0 : index
    %c0_16 = arith.constant 0 : index
    %c0_17 = arith.constant 0 : index
    %26 = vector.load %arg4[%c0_15, %c0_16, %c0_17] : memref<1x8x256xf32, #tpu.memory_space<vmem>>, vector<1x8x256xf32>
    %27 = vector.shape_cast %26 : vector<1x8x256xf32> to vector<8x256xf32>
    %28 = vector.shape_cast %25 : vector<8x256xf32> to vector<1x8x256xf32>
    tpu.vector_store %arg4[%c0_15, %c0_16, %c0_17], %28 {strides = array<i32>} : memref<1x8x256xf32, #tpu.memory_space<vmem>>, vector<1x8x256xf32>,
    return
  }
  func.func @transform_0(%arg0: i32) -> (i32, i32, i32) {
    %c0_i32 = arith.constant 0 : i32
    %c0_i32_0 = arith.constant 0 : i32
    %c0_i32_1 = arith.constant 0 : i32
    return %arg0, %c0_i32, %c0_i32_0 : i32, i32, i32
  }
  func.func @transform_1(%arg0: i32) -> (i32, i32) {
    %c0_i32 = arith.constant 0 : i32
    %c0_i32_0 = arith.constant 0 : i32
    %c0_i32_1 = arith.constant 0 : i32
    return %c0_i32, %c0_i32_0 : i32, i32
  }
  func.func @transform_2(%arg0: i32) -> (i32, i32) {
    %c0_i32 = arith.constant 0 : i32
    %c0_i32_0 = arith.constant 0 : i32
    %c0_i32_1 = arith.constant 0 : i32
    return %c0_i32, %c0_i32_0 : i32, i32
  }
  func.func @transform_3(%arg0: i32) -> (i32, i32, i32) {
    %c0_i32 = arith.constant 0 : i32
    %c0_i32_0 = arith.constant 0 : i32
    %c0_i32_1 = arith.constant 0 : i32
    return %arg0, %c0_i32, %c0_i32_0 : i32, i32, i32
  }
}

</mosaic_0001>

<bundles_post_ra>
// kernel: tpu_custom_call.1
= control target key start
LH: loop header
LB: loop body
LE: loop exit
PB: predicated region body
PF: predicated region fallthrough
CT: control target
= control target key end

     0   :  { %8 = vsyncpa [#allocation3], 0  ;;  %s977_s0 = inlined_call_operand.hbm [shape: f32[2,8,256], index: 0, kind: input, shape index: {}]   ;;  %s978_s1 = inlined_call_operand.vmem [shape: f32[2,8], index: 1, kind: input, shape index: {}]   ;;  %s979_s2 = inlined_call_operand.vmem [shape: f32[8,2], index: 2, kind: input, shape index: {}]   ;;  %s980_s3 = inlined_call_operand.hbm [shape: f32[2,8,256], index: 3, kind: output, shape index: {}]  }
   0x1   :  { %10 = vsyncpa [#allocation3 + $0x1], 0 }
   0x2   :  { %11 = vsyncpa [#allocation4], 0 }
   0x3   :  { %13 = vsyncpa [#allocation4 + $0x1], 0  ;;  %s820_s12 = smov 0   ;;  %s822_s13 = smov 0  }
   0x4   :  { %s824_s14 = smov 0   ;;  %s826_s15 = smov 0  }
   0x5 LB: > { %s841_s16 = sadd.s32 4294967295, %s793_s15   ;;  %s595_s17 = sadd.s32 4294967294, %s793_s15   ;;  %s793_s15 = sphi %s826_s15, %s997_s15   ;;  %s789_s14 = sphi %s824_s14, %s996_s14   ;;  %s785_s13 = sphi %s822_s13, %s995_s13   ;;  %s781_s12 = sphi %s820_s12, %s994_s12  }
   0x6   : > { %s845_s18 = sadd.s32 1, %s793_s15   ;;  %s26_s19 = sadd.s32 1, %s789_s14 }
   0x7   : > { %s23_s20 = ssub.s32 %s793_s15, %s845_s18  ;;  %p33_p0 = scmp.ne.s32.totalorder %s789_s14, %s785_s13 }
   0x8   : > { %p24_p1 = scmp.eq.s32.totalorder %s23_s20, 0  ;;  %p34_p2 = scmp.eq.s32.totalorder %s793_s15, 0 }
   0x9   : > { %p39_p3 = scmp.ne.s32.totalorder %s785_s13, %s781_s12  ;;  %p40_p4 = scmp.eq.s32.totalorder %s841_s16, 0 }
   0xa   : > { %s857_s21 = scalar_select %p24_p1, %s789_s14, %s26_s19  }
   0xb   : > { %p859_p5 = por %p34_p2, %p33_p0  ;;  %p863_p6 = por %p40_p4, %p39_p3 }
   0xc   : > { %p105_p7 = scmp.eq.s32.totalorder %s841_s16, 1  ;;  %p111_p8 = scmp.eq.s32.totalorder %s595_s17, 1 }
   0xd   : > { %s984_s23 = scalar_select %p863_p6, 1, 0 }
   0xe   : > { %p658_p10 = scmp.lt.s32.totalorder %s793_s15, 2  ;;  %p870_p11 = por %p105_p7, %p33_p0 }
   0xf   : > { %p874_p12 = por %p111_p8, %p39_p3  ;;  %s137_s26 = sand.u32 1, %s789_s14  }
  0x10   : > { %s985_s24 = scalar_select %p870_p11, 1, 0 }
  0x11   : > { %s986_s25 = scalar_select %p874_p12, 1, 0 }
  0x12   : > { %s616_s27 = sshll.u32 %s793_s15, 8  ;;  %s598_s28 = sshll.u32 %s137_s26, 4 }
  0x13   : > { %s883_s4 = scalar_lea.hbm %s977_s0, %s616_s27  ;;  %s141_s5 = scalar_lea.vmem [#allocation2], %s598_s28 }
  0x14   : > { %s149_s6 = sshll.u32 %s141_s5, 4  ;;  %p887_p13 = pnand %p658_p10, %p859_p5  ;;  %s891_s6 = int_to_ptr.vmem [resolvable:$true] %s149_s6 }
  0x15   : > { %s138_s8 = scalar_lea.sflag [#allocation3], %s137_s26  ;;  %s701_s9 = scalar_lea.hbm %s883_s4, 256 }
  0x16   : > { %p702_p2 = scmp.ne.s32.totalorder %s883_s4, %s701_s9  ;;  %p703_p3 = pneg %p887_p13 }
  0x17   : > { %s706_s17 = scalar_lea.hbm %s977_s0, 512  ;;  %p707_p5 = scmp.lt.s32.totalorder %s883_s4, %s977_s0 }
  0x18   : > { %p704_p4 = pnand %p703_p3, %p702_p2  ;;  %p708_p8 = scmp.lt.s32.totalorder %s706_s17, %s701_s9 }
  0x1a   : > { %p705_p7 = pneg %p704_p4  ;;  %p709_p10 = por %p708_p8, %p707_p5 }
  0x1c   : > { %p710_p9 = pnand %p709_p10, %p705_p7 }
  0x1e   : > { %713 = shalt.err (!%p710_p9)
}
  0x1f   : > { %s714_s22 = scalar_lea.vmem %s891_s6, 256  ;;  %s795_s26 = smov [#allocation2]  }
  0x20   : > { %p715_p0 = scmp.ne.s32.totalorder %s891_s6, %s714_s22  ;;  %s719_s27 = sshll.u32 %s795_s26, 4  ;;  %s720_s27 = int_to_ptr.vmem [resolvable:$false] %s719_s27 }
  0x21   : > { %s721_s28 = scalar_lea.vmem %s720_s27, 512  ;;  %p722_p4 = scmp.lt.s32.totalorder %s891_s6, %s720_s27 }
  0x22   : > { %p717_p1 = pnand %p715_p0, %p703_p3  ;;  %p723_p12 = scmp.lt.s32.totalorder %s721_s28, %s714_s22 }
  0x24   : > { %p718_p2 = pneg %p717_p1  ;;  %p724_p11 = por %p723_p12, %p722_p4 }
  0x26   : > { %p725_p6 = pnand %p724_p11, %p718_p2 }
  0x28   : > { %728 = shalt.err (!%p725_p6)
}
  0x29   : > { %653 = dma.hbm_to_vmem [thread:$0]  (!%p887_p13), %s883_s4, 256, %s891_s6, %s138_s8  }
  0x2a   : > { %p988_p9 = scmp.lt.s32.totalorder %s793_s15, 3  ;;  %p989_p7 = scmp.ge.s32.totalorder %s793_s15, 1 }
  0x2c   : > { %p155_p0 = pnand %p989_p7, %p988_p9 }
  0x2d   : > { %s918_s29 = sand.u32 (!%p155_p0), 1, %s785_s13   ;;  %p990_p6 = scmp.ne.s32.totalorder (!%p155_p0), %s984_s23, 0 }
  0x2e   : > { %158 = sbr.rel (%p155_p0) target bundleno = 760 (0x2f8), region = 32  ;;  %s602_s30 = sshll.u32 (!%p155_p0), %s918_s29, 4 }
  0x2f   : > { %s161_s5 = scalar_lea.sflag (!%p155_p0), [#allocation3], %s918_s29  ;;  %s164_s7 = scalar_lea.vmem (!%p155_p0), [#allocation2], %s602_s30 }
  0x33   : > { %772 = dma.done.wait (%p990_p6), %s161_s5, 256  }
  0x34   : > { %774 = vsyncadd (%p990_p6), %s161_s5, 4294967040  ;;  %v187_v0 = vld [vmem:[%s164_s7] sm:$0xff]  ;;  %v188_v1 = vld [vmem:[%s164_s7 + $0x8] sm:$0xff]  ;;  %v796_v4 = vmov 0.0   ;;  %vm797_vm0 = vmmov 0   ;;  %vm198_vm1 = vcmask 64512  }
  0x35   : > { %v189_v2 = vadd.f32 %v188_v1, %v187_v0  ;;  %v192_v3 = vmax.f32 %v187_v0, %v188_v1  ;;  %626 = vmatprep.subr.mxu0 %v796_v4  ;;  %631 = vmatprep.subr.mxu1 %v796_v4  ;;  %v195_v7 = vld [vmem:[%s978_s1] sm:$0x3]  ;;  %vm348_vm2 = vcmask 1041408   ;;  %vm344_vm3 = vcmask 15360   ;;  %s617_s9 = sshll.u32 %s841_s16, 8  ;;  %s186_s10 = scalar_lea.vmem [#allocation5], %s602_s30 }
  0x36   : > { %628 = vmatprep.mubr.msk.f32.mxu0 %vm797_vm0, %v796_v4  ;;  %633 = vmatprep.mubr.msk.f32.mxu1 %vm797_vm0, %v796_v4  ;;  %v196_v11 = vld [vmem:[%s979_s2] sm:$0xff]  ;;  %v798_v16 = vmov 0   ;;  %s525_s11 = sshll.u32 %s186_s10, 4  ;;  %s940_s20 = scalar_lea.hbm %s980_s3, %s617_s9  ;;  %s526_s11 = int_to_ptr.vmem [resolvable:$true] %s525_s11 }
  0x37   : > { %190 = vadd.xlane.f32.xlu0 %v189_v2  ;;  %695 = vset.pattern.permute.xlu1 %v798_v16  ;;  %s511_s22 = scalar_lea.sflag [#allocation4], %s918_s29  ;;  %s729_s26 = scalar_lea.vmem %s526_s11, 256 }
  0x38   : > { %696 = vset.pattern.permute.xlu0 %v798_v16  ;;  %p730_p11 = scmp.ne.s32.totalorder %s526_s11, %s729_s26  ;;  %p991_p12 = scmp.ne.s32.totalorder %s985_s24, 0 }
  0x39   : > { %s799_s16 = smov [#allocation5]  }
  0x3a   : > { %p731_p13 = pnand %p730_p11, %p991_p12  ;;  %s733_s27 = sshll.u32 %s799_s16, 4  ;;  %s734_s27 = int_to_ptr.vmem [resolvable:$false] %s733_s27 }
  0x3b   : > { %193 = vmax.xlane.f32.xlu0 %v192_v3  ;;  %s735_s28 = scalar_lea.vmem %s734_s27, 512  ;;  %p736_p3 = scmp.lt.s32.totalorder %s526_s11, %s734_s27 }
  0x3c   : > { %p732_p1 = pneg %p731_p13  ;;  %p737_p5 = scmp.lt.s32.totalorder %s735_s28, %s729_s26 }
  0x3e   : > { %p738_p8 = por %p737_p5, %p736_p3 }
  0x40   : > { %p739_p10 = pnand %p738_p8, %p732_p1 }
  0xc0   : > { %v191_v5 = vpop.xlane.xlu0 %190 }
  0xc1   : > { %v197_v6 = vmul.f32 0.00390625, %v191_v5 }
  0xc3   : > { %627 = vmatpush3.msra.mxu0 %v197_v6 }
  0xc4   : > { %629 = vmatmul.mubr.msk.f32.vlgmr.msra.gmra.mxu0 %vm198_vm1, %v195_v7  ;;  %v194_v8 = vpop.xlane.xlu0 %193  ;;  %636 = vmatprep.subr.mxu0 %v796_v4 }
  0xc5   : > { %632 = vmatpush3.msra.mxu1 %v194_v8  ;;  %638 = vmatprep.mubr.msk.f32.mxu0 %vm797_vm0, %v796_v4 }
  0xc6   : > { %634 = vmatmul.mubr.msk.f32.vlgmr.msra.gmra.mxu1 %vm198_vm1, %v195_v7  ;;  %641 = vmatprep.subr.mxu1 %v796_v4 }
  0xc7   : > { %643 = vmatprep.mubr.msk.f32.mxu1 %vm797_vm0, %v796_v4 }
 0x184   : > { %v268_v9 = vpop.f32.mrf.mxu0 }
 0x185   : > { %v272_v10 = vmax.f32 %v268_v9, 0.0 }
 0x186   : > { %v630_v12 = vpop.f32.mrf.mxu0  ;;  %v339_v13 = vpop.f32.mrf.mxu1 }
 0x187   : > { %v343_v14 = vmax.f32 %v339_v13, 0.0  ;;  %642 = vmatpush3.msk.msra.mxu1 %vm348_vm2, %v272_v10 }
 0x188   : > { %v635_v15 = vpop.f32.mrf.mxu1  ;;  %644 = vmatmul.mubr.msk.f32.vlgmr.msra.gmra.mxu1 %vm344_vm3, %v196_v11 }
 0x189   : > { %637 = vmatpush3.msk.msra.mxu0 %vm348_vm2, %v343_v14 }
 0x18a   : > { %639 = vmatmul.mubr.msk.f32.vlgmr.msra.gmra.mxu0 %vm344_vm3, %v196_v11 }
 0x248   : > { %v491_v17 = vpop.f32.mrf.mxu1 }
 0x24a   : > { %v418_v18 = vpop.f32.mrf.mxu0  ;;  %v645_v19 = vpop.f32.mrf.mxu1 }
 0x24b   : > { %v492_v20 = vadd.f32 %v491_v17, %v418_v18 }
 0x24c   : > { %v640_v21 = vpop.f32.mrf.mxu0 }
 0x24d   : > { %v610_v22 = vmul.f32 -1.442695, %v492_v20 }
 0x24f   : > { %697 = vpow2.f32 %v610_v22 }
 0x25c   : > { %v698_v23 = vpop.eup %697 }
 0x25d   : > { %v498_v24 = vadd.f32 1.0, %v698_v23 }
 0x25f   : > { %699 = vrcp.f32 %v498_v24 }
 0x26c   : > { %v700_v25 = vpop.eup %699 }
 0x26d   : > { %503 = vperm.xlu1 %695, %v700_v25  }
 0x2e8   : > { %v504_v26 = vpop.permute.xlu1 %503 }
 0x2e9   : > { %v506_v27 = vmul.f32 %v504_v26, %v187_v0  ;;  %v507_v28 = vmul.f32 %v504_v26, %v188_v1 }
 0x2eb   : > { %508 = vst [vmem:[%s186_s10] sm:$0xff] %v506_v27  ;;  %509 = vst [vmem:[%s186_s10 + $0x8] sm:$0xff] %v507_v28 }
 0x2ec   : > { %742 = shalt.err (!%p739_p10)
}
 0x2ed   : > { %s743_s30 = scalar_lea.hbm %s940_s20, 256  ;;  %s747_s7 = scalar_lea.hbm %s980_s3, 512 }
 0x2ee   : > { %p744_p2 = scmp.ne.s32.totalorder %s940_s20, %s743_s30  ;;  %p748_p7 = scmp.lt.s32.totalorder %s940_s20, %s980_s3 }
 0x2ef   : > { %p749_p0 = scmp.lt.s32.totalorder %s747_s7, %s743_s30 }
 0x2f0   : > { %p745_p4 = pnand %p744_p2, %p991_p12 }
 0x2f1   : > { %p750_p6 = por %p749_p0, %p748_p7 }
 0x2f2   : > { %p746_p9 = pneg %p745_p4 }
 0x2f4   : > { %p751_p11 = pnand %p750_p6, %p746_p9 }
 0x2f6   : > { %754 = shalt.err (!%p751_p11)
}
 0x2f7   : > { %648 = dma.vmem_to_hbm [thread:$0]  (%p991_p12), %s526_s11, 256, %s940_s20, %s511_s22  }
 0x2f8 PF: > { %s537_s23 = sand.u32 1, %s781_s12   ;;  %p992_p13 = scmp.ne.s32.totalorder %s986_s25, 0 }
 0x2f9   : > { %p993_p1 = scmp.ge.s32.totalorder %s793_s15, 2  ;;  %s538_s8 = scalar_lea.sflag [#allocation4], %s537_s23 }
 0x2fb   : > { %p655_p3 = pnand %p993_p1, %p992_p13 }
 0x2fd   : > { %p656_p5 = pneg %p655_p3 }
 0x2ff   : > { %776 = dma.done.wait (%p656_p5), %s538_s8, 256  }
 0x300   : > { %778 = vsyncadd (%p656_p5), %s538_s8, 4294967040  ;;  %p16_p8 = scmp.ge.s32.totalorder %s845_s18, 4   ;;  %s994_s12 = smov %s785_s13 }
 0x301   : > { %s995_s13 = smov %s789_s14  ;;  %s996_s14 = smov %s857_s21 }
 0x302   : > { %s997_s15 = smov %s845_s18  ;;  %18 = sbr.rel (!%p16_p8) target bundleno = 5 (0x5), region = 77 }
 0x307   :  { %543 = vsyncpa [#allocation3], 1 }
 0x308   :  { %545 = vsyncpa [#allocation3 + $0x1], 1 }
 0x309   :  { %546 = vsyncpa [#allocation4], 1 }
 0x30a   :  { %548 = vsyncpa [#allocation4 + $0x1], 1 }

</bundles_post_ra>
